<compile_context>
chip_gen: v7x
topology: tpu7x:2x2x1
jax: 0.10.0
libtpu: 0.0.40
codegen_flags: <defaults>
</compile_context>

<pallas_src>
import functools

import jax
import jax.numpy as jnp
from jax import lax
from jax.experimental import pallas as pl
from jax.experimental.pallas import tpu as pltpu


def _round_up(x, m):
    return ((x + m - 1) // m) * m


def _matmul_kernel_multi_k(*refs, add_bias):
    """One (tm, tn) output tile accumulated over the K (hidden) grid axis.

    refs: x[tm,tk], w[tn,tk], (bias[1,tn] if add_bias), out[tm,tn], acc[tm,tn]
    """
    if add_bias:
        x_ref, w_ref, b_ref, o_ref, acc_ref = refs
    else:
        x_ref, w_ref, o_ref, acc_ref = refs
        b_ref = None

    k = pl.program_id(2)

    @pl.when(k == 0)
    def _():
        acc_ref[...] = jnp.zeros_like(acc_ref)

    # Contract along H (last dim of both operands) -> [tm, tn], f32 accumulate.
    acc_ref[...] += lax.dot_general(
        x_ref[...], w_ref[...],
        dimension_numbers=(((1,), (1,)), ((), ())),
        preferred_element_type=jnp.float32)

    @pl.when(k == pl.num_programs(2) - 1)
    def _():
        acc = acc_ref[...]
        if add_bias:
            acc = acc + b_ref[...].astype(jnp.float32)
        o_ref[...] = acc.astype(o_ref.dtype)


def _matmul_kernel_single_k(*refs, add_bias):
    """Whole-H reduction in one shot; writes the output tile directly."""
    if add_bias:
        x_ref, w_ref, b_ref, o_ref = refs
    else:
        x_ref, w_ref, o_ref = refs
        b_ref = None

    acc = lax.dot_general(
        x_ref[...], w_ref[...],
        dimension_numbers=(((1,), (1,)), ((), ())),
        preferred_element_type=jnp.float32)
    if add_bias:
        acc = acc + b_ref[...].astype(jnp.float32)
    o_ref[...] = acc.astype(o_ref.dtype)


@functools.partial(jax.jit, static_argnames=("skip_bias_add",))
def domino_async_column_parallel_linear(x, weight, bias, *, skip_bias_add=False):
    """Forward of DominoAsyncColumnParallelLinear.

    x:      [S, B, H]   (seq, batch, hidden)
    weight: [O, H]      (output_size, input_size)
    bias:   [O] or None
    Returns (output [S, B, O], output_bias or None)
    """
    S, B, H = x.shape
    O = weight.shape[0]
    M = S * B
    out_dtype = x.dtype
    itemsize = jnp.dtype(x.dtype).itemsize

    add_bias = (bias is not None) and (not skip_bias_add)

    # --- Tile sizes (portable defaults, clamped to the problem) ----------------
    # M (sublane) tiles need 8-alignment; O and H are lane dims -> 128-alignment.
    tm = min(512, _round_up(M, 8))
    tn = min(512, _round_up(O, 128))
    tk = min(512, _round_up(H, 128))

    M_pad = _round_up(M, tm)
    O_pad = _round_up(O, tn)
    H_pad = _round_up(H, tk)

    # --- Pad operands to tile multiples (zero-padding K is exact) --------------
    x2 = x.reshape(M, H)
    if (M_pad, H_pad) != (M, H):
        x2 = jnp.pad(x2, ((0, M_pad - M), (0, H_pad - H)))
    w = weight
    if (O_pad, H_pad) != (O, H):
        w = jnp.pad(w, ((0, O_pad - O), (0, H_pad - H)))

    nk = H_pad // tk
    grid_mn = (M_pad // tm, O_pad // tn)

    cost = pl.CostEstimate(
        flops=2 * M_pad * H_pad * O_pad,
        transcendentals=0,
        bytes_accessed=(M_pad * H_pad + O_pad * H_pad + M_pad * O_pad) * itemsize,
    )

    # Double-buffered input/weight/bias/output tiles + f32 accumulator, headroom.
    vmem_need = 2 * (tm * tk + tn * tk + tn + tm * tn) * itemsize + tm * tn * 4
    vmem_limit = int(min(max(2 * vmem_need, 32 << 20), 64 << 20))

    operands = [x2, w]
    if add_bias:
        b2 = bias if O_pad == O else jnp.pad(bias, (0, O_pad - O))
        operands.append(b2.reshape(1, O_pad))

    if nk == 1:
        # Single K step: 2-D grid, no accumulator scratch, direct writeback.
        grid = grid_mn
        in_specs = [
            pl.BlockSpec((tm, tk), lambda i, j: (i, 0)),     # activations
            pl.BlockSpec((tn, tk), lambda i, j: (j, 0)),     # weight [O, H]
        ]
        if add_bias:
            in_specs.append(pl.BlockSpec((1, tn), lambda i, j: (0, j)))
        out_specs = pl.BlockSpec((tm, tn), lambda i, j: (i, j))
        scratch_shapes = []
        dim_sem = ("parallel", "parallel")
        kernel = functools.partial(_matmul_kernel_single_k, add_bias=add_bias)
    else:
        grid = grid_mn + (nk,)
        in_specs = [
            pl.BlockSpec((tm, tk), lambda i, j, k: (i, k)),  # activations
            pl.BlockSpec((tn, tk), lambda i, j, k: (j, k)),  # weight [O, H]
        ]
        if add_bias:
            in_specs.append(pl.BlockSpec((1, tn), lambda i, j, k: (0, j)))
        out_specs = pl.BlockSpec((tm, tn), lambda i, j, k: (i, j))
        scratch_shapes = [pltpu.VMEM((tm, tn), jnp.float32)]
        dim_sem = ("parallel", "parallel", "arbitrary")
        kernel = functools.partial(_matmul_kernel_multi_k, add_bias=add_bias)

    out2 = pl.pallas_call(
        kernel,
        out_shape=jax.ShapeDtypeStruct((M_pad, O_pad), out_dtype),
        grid_spec=pltpu.PrefetchScalarGridSpec(
            num_scalar_prefetch=0,
            grid=grid,
            in_specs=in_specs,
            out_specs=out_specs,
            scratch_shapes=scratch_shapes,
        ),
        compiler_params=pltpu.CompilerParams(
            dimension_semantics=dim_sem,
            vmem_limit_bytes=vmem_limit,
        ),
        cost_estimate=cost,
    )(*operands)

    if (M_pad, O_pad) != (M, O):
        out2 = out2[:M, :O]
    output = out2.reshape(S, B, O)
    output_bias = bias if skip_bias_add else None
    # TODO(synk): backward's async all_reduce over the TP group (handle_dic/h_id)
    # is distributed-training plumbing with no forward-pass Pallas equivalent.
    return output, output_bias


if __name__ == "__main__":
    # Small, module-consistent shapes: seq=8, batch=2, input_size(H)=32, output_size(O)=64.
    S, B, H, O = 8, 2, 32, 64

    key = jax.random.PRNGKey(0)
    kx, kw = jax.random.split(key)
    x = jax.random.normal(kx, (S, B, H), dtype=jnp.float32)
    # Deterministic "init_method" stand-in for the weight; bias.zero_() as in __init__.
    weight = jax.random.normal(kw, (O, H), dtype=jnp.float32) * 0.02
    bias = jnp.zeros((O,), dtype=jnp.float32)

    out, out_bias = domino_async_column_parallel_linear(
        x, weight, bias, skip_bias_add=False)
    out = jax.block_until_ready(out)

    # Reference: torch.matmul(inp, weight.t()) + bias.
    ref = jnp.einsum("sbh,oh->sbo", x, weight) + bias
    assert out.shape == (S, B, O)
    assert out_bias is None
    assert jnp.allclose(out, ref, atol=1e-4, rtol=1e-4)

    # Also exercise the skip_bias_add path (bias returned, not added).
    out2, out_bias2 = domino_async_column_parallel_linear(
        x, weight, bias, skip_bias_add=True)
    out2 = jax.block_until_ready(out2)
    ref2 = jnp.einsum("sbh,oh->sbo", x, weight)
    assert jnp.allclose(out2, ref2, atol=1e-4, rtol=1e-4)
    assert out_bias2 is not None and out_bias2.shape == (O,)

    # Larger multi-K-tile path (forces the accumulator kernel) with bf16 inputs.
    S2, B2, H2, O2 = 16, 4, 1024, 768
    kx2, kw2, kb2 = jax.random.split(jax.random.PRNGKey(0), 3)
    xb = jax.random.normal(kx2, (S2, B2, H2), dtype=jnp.float32).astype(jnp.bfloat16)
    wb = (jax.random.normal(kw2, (O2, H2), dtype=jnp.float32) * 0.02).astype(jnp.bfloat16)
    bb = (jax.random.normal(kb2, (O2,), dtype=jnp.float32) * 0.1).astype(jnp.bfloat16)
    out3, _ = domino_async_column_parallel_linear(xb, wb, bb, skip_bias_add=False)
    out3 = jax.block_until_ready(out3)
    ref3 = (jnp.einsum("sbh,oh->sbo", xb.astype(jnp.float32), wb.astype(jnp.float32))
            + bb.astype(jnp.float32))
    assert jnp.allclose(out3.astype(jnp.float32), ref3, atol=2e-1, rtol=2e-2)

    print("KERNEL_OK")
</pallas_src>

<mosaic_0001>
module attributes {stable_mosaic.version = 11 : i64} {
  func.func @_matmul_kernel_single_k(%arg0: i32, %arg1: i32, %arg2: memref<16x128xf32, #tpu.memory_space<vmem>>, %arg3: memref<128x128xf32, #tpu.memory_space<vmem>>, %arg4: memref<1x128xf32, #tpu.memory_space<vmem>>, %arg5: memref<16x128xf32, #tpu.memory_space<vmem>>) attributes {dimension_semantics = [#tpu.dimension_semantics<parallel>, #tpu.dimension_semantics<parallel>], iteration_bounds = array<i64: 1, 1>, scalar_prefetch = 0 : i64, scratch_operands = 0 : i64, tpu.core_type = #tpu.core_type<tc>, window_params = [{transform_indices = @transform_0, window_bounds = array<i64: 16, 128>}, {transform_indices = @transform_1, window_bounds = array<i64: 128, 128>}, {transform_indices = @transform_2, window_bounds = array<i64: 1, 128>}, {transform_indices = @transform_3, window_bounds = array<i64: 16, 128>}]} {
    %c0 = arith.constant 0 : index
    %c0_0 = arith.constant 0 : index
    %0 = vector.load %arg2[%c0, %c0_0] : memref<16x128xf32, #tpu.memory_space<vmem>>, vector<16x128xf32>
    %c0_1 = arith.constant 0 : index
    %c0_2 = arith.constant 0 : index
    %1 = vector.load %arg3[%c0_1, %c0_2] : memref<128x128xf32, #tpu.memory_space<vmem>>, vector<128x128xf32>
    %cst = arith.constant dense<0.000000e+00> : vector<16x128xf32>
    %2 = tpu.matmul %0, %1, %cst {dimension_numbers = #tpu.dot_dimension_numbers<[1], [1], [0], [0], [0, 0, 1, 0], [], []>} : vector<16x128xf32>, vector<128x128xf32>, vector<16x128xf32> -> vector<16x128xf32>
    %c0_3 = arith.constant 0 : index
    %c0_4 = arith.constant 0 : index
    %3 = vector.load %arg4[%c0_3, %c0_4] : memref<1x128xf32, #tpu.memory_space<vmem>>, vector<1x128xf32>
    %4 = vector.broadcast %3 : vector<1x128xf32> to vector<16x128xf32>
    %5 = arith.addf %2, %4 : vector<16x128xf32>
    %c0_5 = arith.constant 0 : index
    %c0_6 = arith.constant 0 : index
    %6 = vector.load %arg5[%c0_5, %c0_6] : memref<16x128xf32, #tpu.memory_space<vmem>>, vector<16x128xf32>
    tpu.vector_store %arg5[%c0_5, %c0_6], %5 {strides = array<i32>} : memref<16x128xf32, #tpu.memory_space<vmem>>, vector<16x128xf32>,
    return
  }
  func.func @transform_0(%arg0: i32, %arg1: i32) -> (i32, i32) {
    %c0_i32 = arith.constant 0 : i32
    %c0_i32_0 = arith.constant 0 : i32
    return %arg0, %c0_i32 : i32, i32
  }
  func.func @transform_1(%arg0: i32, %arg1: i32) -> (i32, i32) {
    %c0_i32 = arith.constant 0 : i32
    %c0_i32_0 = arith.constant 0 : i32
    return %arg1, %c0_i32 : i32, i32
  }
  func.func @transform_2(%arg0: i32, %arg1: i32) -> (i32, i32) {
    %c0_i32 = arith.constant 0 : i32
    %c0_i32_0 = arith.constant 0 : i32
    return %c0_i32, %arg1 : i32, i32
  }
  func.func @transform_3(%arg0: i32, %arg1: i32) -> (i32, i32) {
    %c0_i32 = arith.constant 0 : i32
    return %arg0, %arg1 : i32, i32
  }
}

</mosaic_0001>

<bundles_post_ra>
// kernel: domino_async_column_parallel_linear.1
= control target key start
LH: loop header
LB: loop body
LE: loop exit
PB: predicated region body
PF: predicated region fallthrough
CT: control target
= control target key end

     0   :  { %s338_s0 = inlined_call_operand.vmem [shape: f32[16,128], index: 0, kind: input, shape index: {}]   ;;  %s339_s1 = inlined_call_operand.vmem [shape: f32[128,128], index: 1, kind: input, shape index: {}]   ;;  %s340_s2 = inlined_call_operand.vmem [shape: f32[1,128], index: 2, kind: input, shape index: {}]   ;;  %s341_s3 = inlined_call_operand.hbm [shape: f32[16,128], index: 3, kind: output, shape index: {}]  }
   0x1   :  { %v17_v0 = vld [vmem:[%s339_s1] sm:$0xff]  ;;  %v18_v1 = vld [vmem:[%s339_s1 + $0x8] sm:$0xff]  ;;  %v19_v2 = vld [vmem:[%s339_s1 + $0x10] sm:$0xff] }
   0x2   :  { %v187_v3 = vpack.c.bf16 %v18_v1, %v17_v0  ;;  %v20_v4 = vld [vmem:[%s339_s1 + $0x18] sm:$0xff]  ;;  %v15_v6 = vld [vmem:[%s338_s0] sm:$0xff]  ;;  %v22_v8 = vld [vmem:[%s339_s1 + $0x28] sm:$0xff] }
   0x3   :  { %v191_v5 = vpack.c.bf16 %v20_v4, %v19_v2  ;;  %v21_v7 = vld [vmem:[%s339_s1 + $0x20] sm:$0xff]  ;;  %184 = vmatprep.mubr.f32.mxu0 %v15_v6 }
   0x4   :  { %188 = vmatprep.subr.bf16.mxu0 %v187_v3 }
   0x5   :  { %190 = vmatpush3.bf16.xpose.msra.mxu0 %v187_v3 }
   0x6   :  { %192 = vmatprep.subr.bf16.mxu0 %v191_v5 }
   0x7   :  { %8 = vsyncpa [#allocation3], 0  ;;  %v195_v9 = vpack.c.bf16 %v22_v8, %v21_v7  ;;  %v23_v10 = vld [vmem:[%s339_s1 + $0x30] sm:$0xff]  ;;  %v24_v11 = vld [vmem:[%s339_s1 + $0x38] sm:$0xff]  ;;  %s246_s23 = smov [#allocation2]  }
   0x8   :  { %v199_v12 = vpack.c.bf16 %v24_v11, %v23_v10  ;;  %v25_v13 = vld [vmem:[%s339_s1 + $0x40] sm:$0xff]  ;;  %v26_v14 = vld [vmem:[%s339_s1 + $0x48] sm:$0xff]  ;;  %v27_v16 = vld [vmem:[%s339_s1 + $0x50] sm:$0xff]  ;;  %s122_s24 = sshll.u32 %s246_s23, 4  ;;  %s123_s24 = int_to_ptr.vmem [resolvable:$true] %s122_s24 }
   0x9   :  { %v203_v15 = vpack.c.bf16 %v26_v14, %v25_v13  ;;  %v28_v17 = vld [vmem:[%s339_s1 + $0x58] sm:$0xff]  ;;  %v29_v19 = vld [vmem:[%s339_s1 + $0x60] sm:$0xff]  ;;  %v30_v20 = vld [vmem:[%s339_s1 + $0x68] sm:$0xff]  ;;  %p227_p1 = scmp.lt.s32.totalorder %s123_s24, %s123_s24 }
   0xa   :  { %v207_v18 = vpack.c.bf16 %v28_v17, %v27_v16  ;;  %v211_v21 = vpack.c.bf16 %v30_v20, %v29_v19  ;;  %v31_v22 = vld [vmem:[%s339_s1 + $0x70] sm:$0xff]  ;;  %v32_v23 = vld [vmem:[%s339_s1 + $0x78] sm:$0xff]  ;;  %v16_v25 = vld [vmem:[%s338_s0 + $0x8] sm:$0xff]  ;;  %s222_s1 = scalar_lea.vmem %s123_s24, 256 }
   0xb   :  { %v215_v24 = vpack.c.bf16 %v32_v23, %v31_v22  ;;  %v133_v26 = vld [vmem:[%s340_s2] ss:$0 sm:$0xff]  ;;  %p223_p0 = scmp.ne.s32.totalorder %s123_s24, %s222_s1  ;;  %p228_p2 = scmp.lt.s32.totalorder %s222_s1, %s222_s1 }
   0xd   :  { %194 = vmatpush3.bf16.xpose.msra.mxu0 %v191_v5  ;;  %p229_p3 = por %p228_p2, %p227_p1 }
   0xe   :  { %196 = vmatprep.subr.bf16.mxu0 %v195_v9 }
   0xf   :  { %p230_p4 = pnand %p229_p3, %p223_p0 }
  0x15   :  { %198 = vmatpush3.bf16.xpose.msra.mxu0 %v195_v9 }
  0x16   :  { %200 = vmatprep.subr.bf16.mxu0 %v199_v12 }
  0x1d   :  { %202 = vmatpush3.bf16.xpose.msra.mxu0 %v199_v12 }
  0x1e   :  { %204 = vmatprep.subr.bf16.mxu0 %v203_v15 }
  0x25   :  { %206 = vmatpush3.bf16.xpose.msra.mxu0 %v203_v15 }
  0x26   :  { %208 = vmatprep.subr.bf16.mxu0 %v207_v18 }
  0x2d   :  { %210 = vmatpush3.bf16.xpose.msra.mxu0 %v207_v18 }
  0x2e   :  { %212 = vmatprep.subr.bf16.mxu0 %v211_v21 }
  0x35   :  { %214 = vmatpush3.bf16.xpose.msra.mxu0 %v211_v21 }
  0x36   :  { %216 = vmatprep.subr.bf16.mxu0 %v215_v24 }
  0x3d   :  { %218 = vmatpush3.bf16.xpose.msra.mxu0 %v215_v24 }
  0x44   :  { %185 = vmatmul.mubr.f32.vlgmr.msra.gmra.mrb[0].mxu0 %v16_v25 }
 0x117   :  { %v186_v27 = vpop.f32.mrb[0].mxu0 }
 0x118   :  { %v112_v28 = vadd.f32 %v186_v27, %v133_v26  ;;  %v106_v29 = vpop.f32.mrb[1].mxu0 }
 0x119   :  { %v107_v30 = vadd.f32 %v133_v26, %v106_v29 }
 0x11a   :  { %116 = vst [vmem:[#allocation2 + $0x8] sm:$0xff] %v112_v28 }
 0x11b   :  { %115 = vst [vmem:[#allocation2] sm:$0xff] %v107_v30 }
 0x11c   :  { %233 = shalt.err (!%p230_p4)
}
 0x11d   :  { %s234_s2 = scalar_lea.hbm %s341_s3, 256 }
 0x11e   :  { %p235_p5 = scmp.ne.s32.totalorder %s341_s3, %s234_s2  ;;  %p238_p6 = scmp.lt.u32.totalorder %s234_s2, %s341_s3 }
 0x120   :  { %p240_p7 = pnand %p238_p6, %p235_p5 }
 0x122   :  { %243 = shalt.err (!%p240_p7)
}
 0x123   :  { %s247_s30 = smov 128   ;;  %s248_s4 = smov 8  }
 0x124   :  { %128 = dma.vmem_to_hbm [thread:$0]  %s123_s24, 256, %s341_s3, [#allocation3], %s247_s30, %s247_s30, %s248_s4  }
 0x125   :  { %244 = dma.done.wait [#allocation3], 256  }
 0x126   :  { %245 = vsyncadd [#allocation3], 4294967040 }
 0x127   :  { %132 = vsyncpa [#allocation3], 1 }

</bundles_post_ra>
